<compile_context>
chip_gen: v5e
topology: v5e:2x2
jax: 0.10.0
libtpu: 0.0.40
codegen_flags: <defaults>
</compile_context>

<pallas_src>
import functools

import jax
import jax.numpy as jnp
from jax.experimental import pallas as pl
from jax.experimental.pallas import tpu as pltpu


def _round_up(x: int, m: int) -> int:
    return ((x + m - 1) // m) * m


# ----------------------------- kernels --------------------------------------


def _linear_kernel_acc_in_out(x_ref, w_ref, b_ref, o_ref):
    """f32 output: accumulate directly into the resident (tm, tn) output block.

    The output index_map ignores k, so the block stays in VMEM across the
    whole K reduction and is written back once -> no scratch, no extra copy.
    """

    @pl.when(pl.program_id(2) == 0)
    def _init():
        # Bias initializes the accumulator (added exactly once).
        o_ref[...] = jnp.broadcast_to(b_ref[...], o_ref.shape).astype(o_ref.dtype)

    o_ref[...] += jnp.dot(
        x_ref[...], w_ref[...], preferred_element_type=jnp.float32
    )


def _linear_kernel_scratch(x_ref, w_ref, b_ref, o_ref, acc_ref):
    """Narrow output dtype (e.g. bf16): f32 VMEM accumulator, cast on last K."""
    k = pl.program_id(2)

    @pl.when(k == 0)
    def _init():
        acc_ref[...] = jnp.broadcast_to(b_ref[...], acc_ref.shape)

    acc_ref[...] += jnp.dot(
        x_ref[...], w_ref[...], preferred_element_type=jnp.float32
    )

    @pl.when(k == pl.num_programs(2) - 1)
    def _finalize():
        o_ref[...] = acc_ref[...].astype(o_ref.dtype)


# ---------------------------- pallas wrapper ---------------------------------


@functools.partial(
    jax.jit, static_argnames=("n_out", "tm", "tn", "tk", "out_dtype")
)
def _linear_pallas(x, wp, bp, *, n_out, tm, tn, tk, out_dtype):
    """x: [B, Kp] (compute dtype, K zero-padded to a tk multiple),
    wp: [Kp, Np] (compute dtype, padded once at init), bp: [1, Np] (f32).
    Returns [B, n_out] in out_dtype."""
    B, Kp = x.shape
    Kp2, Np = wp.shape
    assert Kp == Kp2, (Kp, Kp2)
    assert Np % tn == 0 and Kp % tk == 0, (Np, tn, Kp, tk)

    out_dtype = jnp.dtype(out_dtype)
    grid = (pl.cdiv(B, tm), Np // tn, Kp // tk)  # K innermost (reduction)

    use_scratch = out_dtype != jnp.float32
    kernel = _linear_kernel_scratch if use_scratch else _linear_kernel_acc_in_out
    scratch = [pltpu.VMEM((tm, tn), jnp.float32)] if use_scratch else []

    cbytes = x.dtype.itemsize
    obytes = out_dtype.itemsize
    # Double-buffered x/w/bias/out tiles (+ acc if present), with 2x headroom,
    # clamped to [32 MiB, 48 MiB] so it is valid on v5e/v6e/v7x alike.
    vmem_est = 2 * (tm * tk * cbytes + tk * tn * cbytes + tn * 4 + tm * tn * obytes)
    if use_scratch:
        vmem_est += tm * tn * 4
    vmem_limit = int(min(max(2 * vmem_est, 32 * 1024 * 1024), 48 * 1024 * 1024))

    cost = pl.CostEstimate(
        flops=2 * B * Kp * Np,
        transcendentals=0,
        bytes_accessed=(
            B * Kp * cbytes + Kp * Np * cbytes + Np * 4 + B * Np * obytes
        ),
    )

    out = pl.pallas_call(
        kernel,
        out_shape=jax.ShapeDtypeStruct((B, Np), out_dtype),
        grid_spec=pl.GridSpec(
            grid=grid,
            in_specs=[
                pl.BlockSpec((tm, tk), lambda i, j, k: (i, k)),
                pl.BlockSpec((tk, tn), lambda i, j, k: (k, j)),
                # Bias block ignores i and k -> re-DMA'd only when j changes.
                pl.BlockSpec((1, tn), lambda i, j, k: (0, j)),
            ],
            out_specs=pl.BlockSpec((tm, tn), lambda i, j, k: (i, j)),
            scratch_shapes=scratch,
        ),
        compiler_params=pltpu.CompilerParams(
            # M / N tiles are independent (megacore-shardable on v7x);
            # K is the reduction -> 'arbitrary', kept as the last grid axis.
            dimension_semantics=("parallel", "parallel", "arbitrary"),
            vmem_limit_bytes=vmem_limit,
        ),
        cost_estimate=cost,
    )(x, wp, bp)

    if Np != n_out:
        out = out[:, :n_out]
    return out


class PallasLinear:
    """Pallas-TPU equivalent of torch.nn.Linear (weight layout [out, in]).

    Weight transpose, zero-padding and compute-dtype cast happen ONCE here
    (weight stationary), not on every forward call.  Pass
    compute_dtype=jnp.bfloat16 on v6e/v7x for the fast 256-wide bf16 MXU path
    (accumulation stays in f32).
    """

    def __init__(self, weight, bias, *, tm=256, tn=512, tk=512,
                 compute_dtype=None):
        out_features, in_features = weight.shape
        assert bias.shape == (out_features,), bias.shape

        self.in_features = int(in_features)
        self.out_features = int(out_features)
        self.compute_dtype = compute_dtype

        # Clamp tiles to the alignment-rounded problem so small layers don't
        # over-pad: lane dims stay 128-aligned, sublane dims 8-aligned.
        self.tn = min(tn, _round_up(self.out_features, 128))
        self.tk = min(tk, _round_up(self.in_features, 128))
        self.tm = tm

        self.Kp = _round_up(self.in_features, self.tk)
        self.Np = _round_up(self.out_features, self.tn)

        w = jnp.asarray(weight).T  # [K, N] so the kernel is a plain row-major matmul
        wp = jnp.pad(
            w, ((0, self.Kp - self.in_features), (0, self.Np - self.out_features))
        )
        if compute_dtype is not None:
            wp = wp.astype(compute_dtype)
        self.wp = wp
        self.bp = jnp.pad(
            jnp.asarray(bias, jnp.float32), (0, self.Np - self.out_features)
        ).reshape(1, self.Np)

    def __call__(self, x):
        B, K = x.shape
        assert K == self.in_features, (K, self.in_features)
        out_dtype = x.dtype.type  # preserve the caller's dtype for the output

        xc = x if self.compute_dtype is None else x.astype(self.compute_dtype)
        if self.Kp != K:  # only the reduction axis needs explicit zeros
            xc = jnp.pad(xc, ((0, 0), (0, self.Kp - K)))

        tm = min(self.tm, _round_up(B, 8))
        return _linear_pallas(
            xc, self.wp, self.bp,
            n_out=self.out_features,
            tm=tm, tn=self.tn, tk=self.tk,
            out_dtype=out_dtype,
        )


if __name__ == "__main__":
    key = jax.random.PRNGKey(0)
    kx, kw, kb, kx2, kw2, kb2 = jax.random.split(key, 6)

    # --- Test 1: shapes implied by MyModel(input_size=32, output_size=16) ----
    input_size, output_size, batch = 32, 16, 8
    x = jax.random.normal(kx, (batch, input_size), dtype=jnp.float32)
    # PyTorch nn.Linear stores weight as [out, in].
    w_pt = jax.random.normal(kw, (output_size, input_size), dtype=jnp.float32) * 0.1
    b = jax.random.normal(kb, (output_size,), dtype=jnp.float32) * 0.1

    layer = PallasLinear(w_pt, b)          # weight prep hoisted out of hot path
    y = layer(x)
    jax.block_until_ready(y)

    y_ref = x @ w_pt.T + b[None, :]
    assert y.shape == (batch, output_size)
    assert jnp.allclose(y, y_ref, atol=1e-4, rtol=1e-4), (
        float(jnp.max(jnp.abs(y - y_ref)))
    )

    # --- Test 2: bf16 compute path (scratch-accumulator kernel variant) ------
    in2, out2, b2sz = 256, 128, 16
    x2 = jax.random.normal(kx2, (b2sz, in2), dtype=jnp.float32).astype(jnp.bfloat16)
    w2 = jax.random.normal(kw2, (out2, in2), dtype=jnp.float32) * 0.05
    bb2 = jax.random.normal(kb2, (out2,), dtype=jnp.float32) * 0.05

    layer2 = PallasLinear(w2, bb2, compute_dtype=jnp.bfloat16)
    y2 = layer2(x2)
    jax.block_until_ready(y2)

    w2_bf = w2.astype(jnp.bfloat16).astype(jnp.float32)
    y2_ref = x2.astype(jnp.float32) @ w2_bf.T + bb2[None, :]
    assert y2.shape == (b2sz, out2) and y2.dtype == jnp.bfloat16
    assert jnp.allclose(y2.astype(jnp.float32), y2_ref, atol=2e-2, rtol=2e-2), (
        float(jnp.max(jnp.abs(y2.astype(jnp.float32) - y2_ref)))
    )

    print("KERNEL_OK")
</pallas_src>

<mosaic_0001>
module attributes {stable_mosaic.version = 11 : i64} {
  func.func @_linear_kernel_acc_in_out(%arg0: i32, %arg1: i32, %arg2: i32, %arg3: memref<8x128xf32, #tpu.memory_space<vmem>>, %arg4: memref<128x128xf32, #tpu.memory_space<vmem>>, %arg5: memref<1x128xf32, #tpu.memory_space<vmem>>, %arg6: memref<8x128xf32, #tpu.memory_space<vmem>>) attributes {dimension_semantics = [#tpu.dimension_semantics<parallel>, #tpu.dimension_semantics<parallel>, #tpu.dimension_semantics<arbitrary>], iteration_bounds = array<i64: 1, 1, 1>, scalar_prefetch = 0 : i64, scratch_operands = 0 : i64, tpu.core_type = #tpu.core_type<tc>, window_params = [{transform_indices = @transform_0, window_bounds = array<i64: 8, 128>}, {transform_indices = @transform_1, window_bounds = array<i64: 128, 128>}, {transform_indices = @transform_2, window_bounds = array<i64: 1, 128>}, {transform_indices = @transform_3, window_bounds = array<i64: 8, 128>}]} {
    %c0_i32 = arith.constant 0 : i32
    %0 = arith.cmpi eq, %arg2, %c0_i32 : i32
    %1 = arith.extui %0 : i1 to i32
    %c0_i32_0 = arith.constant 0 : i32
    %2 = arith.cmpi ne, %1, %c0_i32_0 : i32
    scf.if %2 {
      %c0_8 = arith.constant 0 : index
      %c0_9 = arith.constant 0 : index
      %9 = vector.load %arg5[%c0_8, %c0_9] : memref<1x128xf32, #tpu.memory_space<vmem>>, vector<1x128xf32>
      %10 = vector.shape_cast %9 : vector<1x128xf32> to vector<1x128xf32>
      %11 = vector.broadcast %10 : vector<1x128xf32> to vector<8x128xf32>
      %c0_10 = arith.constant 0 : index
      %c0_11 = arith.constant 0 : index
      %12 = vector.load %arg6[%c0_10, %c0_11] : memref<8x128xf32, #tpu.memory_space<vmem>>, vector<8x128xf32>
      tpu.vector_store %arg6[%c0_10, %c0_11], %11 {strides = array<i32>} : memref<8x128xf32, #tpu.memory_space<vmem>>, vector<8x128xf32>,
    } else {
    }
    %c0 = arith.constant 0 : index
    %c0_1 = arith.constant 0 : index
    %3 = vector.load %arg6[%c0, %c0_1] : memref<8x128xf32, #tpu.memory_space<vmem>>, vector<8x128xf32>
    %c0_2 = arith.constant 0 : index
    %c0_3 = arith.constant 0 : index
    %4 = vector.load %arg3[%c0_2, %c0_3] : memref<8x128xf32, #tpu.memory_space<vmem>>, vector<8x128xf32>
    %c0_4 = arith.constant 0 : index
    %c0_5 = arith.constant 0 : index
    %5 = vector.load %arg4[%c0_4, %c0_5] : memref<128x128xf32, #tpu.memory_space<vmem>>, vector<128x128xf32>
    %cst = arith.constant dense<0.000000e+00> : vector<8x128xf32>
    %6 = tpu.matmul %4, %5, %cst {dimension_numbers = #tpu.dot_dimension_numbers<[1], [0], [0], [1], [0, 0, 1, 1], [], []>} : vector<8x128xf32>, vector<128x128xf32>, vector<8x128xf32> -> vector<8x128xf32>
    %7 = arith.addf %3, %6 : vector<8x128xf32>
    %c0_6 = arith.constant 0 : index
    %c0_7 = arith.constant 0 : index
    %8 = vector.load %arg6[%c0_6, %c0_7] : memref<8x128xf32, #tpu.memory_space<vmem>>, vector<8x128xf32>
    tpu.vector_store %arg6[%c0_6, %c0_7], %7 {strides = array<i32>} : memref<8x128xf32, #tpu.memory_space<vmem>>, vector<8x128xf32>,
    return
  }
  func.func @transform_0(%arg0: i32, %arg1: i32, %arg2: i32) -> (i32, i32) {
    %c0_i32 = arith.constant 0 : i32
    return %arg0, %arg2 : i32, i32
  }
  func.func @transform_1(%arg0: i32, %arg1: i32, %arg2: i32) -> (i32, i32) {
    %c0_i32 = arith.constant 0 : i32
    return %arg2, %arg1 : i32, i32
  }
  func.func @transform_2(%arg0: i32, %arg1: i32, %arg2: i32) -> (i32, i32) {
    %c0_i32 = arith.constant 0 : i32
    %c0_i32_0 = arith.constant 0 : i32
    return %c0_i32, %arg1 : i32, i32
  }
  func.func @transform_3(%arg0: i32, %arg1: i32, %arg2: i32) -> (i32, i32) {
    %c0_i32 = arith.constant 0 : i32
    return %arg0, %arg1 : i32, i32
  }
}

</mosaic_0001>

<bundles_post_ra>
// kernel: _linear_pallas.1
= control target key start
LH: loop header
LB: loop body
LE: loop exit
PB: predicated region body
PF: predicated region fallthrough
CT: control target
= control target key end

     0   :  { %8 = vsyncpa [#allocation3], 0  ;;  %s233_s0 = inlined_call_operand.hbm [shape: f32[8,128], index: 0, kind: input, shape index: {}]   ;;  %s234_s1 = inlined_call_operand.hbm [shape: f32[128,128], index: 1, kind: input, shape index: {}]   ;;  %s235_s2 = inlined_call_operand.vmem [shape: f32[1,128], index: 2, kind: input, shape index: {}]   ;;  %s236_s3 = inlined_call_operand.hbm [shape: f32[8,128], index: 3, kind: output, shape index: {}]  }
   0x1   :  { %9 = vsyncpa [#allocation6], 0 }
   0x2   :  { %10 = vsyncpa [#allocation4], 0  ;;  %s16_s14 = sshll.u32 %s233_s0, 4  ;;  %s196_s15 = smov [#allocation2]   ;;  %s17_s14 = int_to_ptr.hbm [resolvable:$true] %s16_s14 }
   0x3   :  { %s18_s16 = sshll.u32 %s196_s15, 4  ;;  %s26_s19 = sshll.u32 %s234_s1, 4  ;;  %s19_s16 = int_to_ptr.vmem [resolvable:$true] %s18_s16  ;;  %s27_s19 = int_to_ptr.hbm [resolvable:$true] %s26_s19 }
   0x4   :  { %21 = dma.hbm_to_vmem [thread:$0]  %s17_s14, 128, %s19_s16, [#allocation3]  }
   0x5   :  { %s197_s20 = smov [#allocation5]   ;;  %s198_s22 = smov 128  }
   0x6   :  { %s28_s21 = sshll.u32 %s197_s20, 4  ;;  %s199_s23 = smov 8   ;;  %s29_s21 = int_to_ptr.vmem [resolvable:$true] %s28_s21 }
   0x7   :  { %34 = dma.hbm_to_vmem [thread:$0]  %s27_s19, 2048, %s29_s21, [#allocation6], %s198_s22, %s198_s22, %s199_s23  }
   0x8   :  { %190 = dma.done.wait [#allocation3], 128  }
   0x9   :  { %191 = vsyncadd [#allocation3], 4294967168 }
   0xa   :  { %192 = dma.done.wait [#allocation6], 2048  }
   0xb   :  { %193 = vsyncadd [#allocation6], 4294965248  ;;  %v71_v0 = vld [vmem:[#allocation5 + $0x78] sm:$0xff]  ;;  %v70_v1 = vld [vmem:[#allocation5 + $0x70] sm:$0xff]  ;;  %s200_s24 = smov [#allocation7]   ;;  %s101_s28 = sshll.u32 %s236_s3, 4  ;;  %s102_s28 = int_to_ptr.hbm [resolvable:$true] %s101_s28 }
   0xc   :  { %72 = vmatpush.msra.mxu0 %v71_v0  ;;  %v69_v2 = vld [vmem:[#allocation5 + $0x68] sm:$0xff]  ;;  %v68_v3 = vld [vmem:[#allocation5 + $0x60] sm:$0xff]  ;;  %v67_v4 = vld [vmem:[#allocation5 + $0x58] sm:$0xff]  ;;  %s99_s25 = sshll.u32 %s200_s24, 4  ;;  %s100_s25 = int_to_ptr.vmem [resolvable:$true] %s99_s25 }
   0xd   :  { %v66_v5 = vld [vmem:[#allocation5 + $0x50] sm:$0xff]  ;;  %v65_v6 = vld [vmem:[#allocation5 + $0x48] sm:$0xff]  ;;  %v64_v7 = vld [vmem:[#allocation5 + $0x40] sm:$0xff] }
   0xe   :  { %73 = vmatpush.msra.mxu0 %v70_v1  ;;  %v63_v8 = vld [vmem:[#allocation5 + $0x38] sm:$0xff]  ;;  %v62_v9 = vld [vmem:[#allocation5 + $0x30] sm:$0xff]  ;;  %v61_v10 = vld [vmem:[#allocation5 + $0x28] sm:$0xff] }
   0xf   :  { %v60_v11 = vld [vmem:[#allocation5 + $0x20] sm:$0xff]  ;;  %v59_v12 = vld [vmem:[#allocation5 + $0x18] sm:$0xff]  ;;  %v58_v13 = vld [vmem:[#allocation5 + $0x10] sm:$0xff] }
  0x10   :  { %74 = vmatpush.msra.mxu0 %v69_v2  ;;  %v57_v14 = vld [vmem:[#allocation5 + $0x8] sm:$0xff]  ;;  %v56_v15 = vld [vmem:[#allocation5] sm:$0xff]  ;;  %v55_v16 = vld [vmem:[#allocation2] sm:$0xff] }
  0x11   :  { %v117_v17 = vld [vmem:[%s235_s2] ss:$0 sm:$0xff] }
  0x12   :  { %75 = vmatpush.msra.mxu0 %v68_v3 }
  0x14   :  { %76 = vmatpush.msra.mxu0 %v67_v4 }
  0x16   :  { %77 = vmatpush.msra.mxu0 %v66_v5 }
  0x18   :  { %78 = vmatpush.msra.mxu0 %v65_v6 }
  0x1a   :  { %79 = vmatpush.msra.mxu0 %v64_v7 }
  0x1c   :  { %80 = vmatpush.msra.mxu0 %v63_v8 }
  0x1e   :  { %81 = vmatpush.msra.mxu0 %v62_v9 }
  0x20   :  { %82 = vmatpush.msra.mxu0 %v61_v10 }
  0x22   :  { %83 = vmatpush.msra.mxu0 %v60_v11 }
  0x24   :  { %84 = vmatpush.msra.mxu0 %v59_v12 }
  0x26   :  { %85 = vmatpush.msra.mxu0 %v58_v13 }
  0x28   :  { %86 = vmatpush.msra.mxu0 %v57_v14 }
  0x2a   :  { %87 = vmatpush.msra.mxu0 %v56_v15 }
  0x2b   :  { %88 = vmatmul.f32.vlgmr.msra.gmra.mxu0 %v55_v16 }
  0xa8   :  { %v89_v18 = vpop.f32.mrf.mxu0 }
  0xa9   :  { %v92_v19 = vadd.f32 %v117_v17, %v89_v18 }
  0xab   :  { %93 = vst [vmem:[#allocation7] sm:$0xff] %v92_v19 }
  0xac   :  { %104 = dma.vmem_to_hbm [thread:$0]  %s100_s25, 128, %s102_s28, [#allocation4]  }
  0xad   :  { %194 = dma.done.wait [#allocation4], 128  }
  0xae   :  { %195 = vsyncadd [#allocation4], 4294967168 }
  0xaf   :  { %109 = vsyncpa [#allocation3], 1 }
  0xb0   :  { %110 = vsyncpa [#allocation6], 1 }
  0xb1   :  { %111 = vsyncpa [#allocation4], 1 }

</bundles_post_ra>
